<compile_context>
chip_gen: v5e
topology: v5e:2x2
jax: 0.10.0
libtpu: 0.0.40
codegen_flags: <defaults>
</compile_context>

<pallas_src>
import math

import jax
import jax.numpy as jnp
from jax.experimental import pallas as pl
from jax.experimental.pallas import tpu as pltpu

LN_EPS = 1e-5
NEG_INF = -1e30                      # finite additive mask bias (safe under f32 exp/max)
VMEM_LIMIT = 48 * 1024 * 1024        # explicit scoped-VMEM budget (< v7x 64 MiB physical)


def _layernorm(z, g, b, eps=LN_EPS):
    m = jnp.mean(z, axis=-1, keepdims=True)
    zc = z - m
    v = jnp.mean(zc * zc, axis=-1, keepdims=True)
    return zc * jax.lax.rsqrt(v + eps) * g + b


def _row_reciprocal(l):
    # EUP approximate reciprocal (+ one Newton step): keeps the divide off the VPU
    # while restoring ~f32 accuracy for the softmax denominator.
    r = pl.reciprocal(l, approx=True)
    return r * (2.0 - l * r)


def _rotate_half(xf, head_dim):
    """Per-head swap of the two feature halves of a lane-dense (T, n*head_dim) slab.

    Two full-width lane rotations + a select: vectorizes over all heads at once
    (no per-head slice/concatenate loop).  Neither branch ever reads wrapped data
    at the positions where it is selected.
    """
    d2 = head_dim // 2
    left = jnp.concatenate([xf[:, d2:], xf[:, :d2]], axis=1)      # x[p + d2]
    right = jnp.concatenate([xf[:, -d2:], xf[:, :-d2]], axis=1)   # x[p - d2]
    lane = jax.lax.broadcasted_iota(jnp.int32, xf.shape, 1)
    return jnp.where((lane % head_dim) < d2, left, right)


# --------------------------------------------------------------------------- #
# Kernel A: x -> q, k, v   (projection + optional LayerNorm + rotary, lane-dense)
# --------------------------------------------------------------------------- #
def _make_qkv_rope_kernel(n_heads, n_kv_heads, head_dim, qk_norm):
    kw = n_kv_heads * head_dim

    def kernel(x_ref, wq_ref, wk_ref, wv_ref, qg_ref, qb_ref, kg_ref, kb_ref,
               cos_ref, sin_ref, q_ref, k_ref, v_ref):
        x = x_ref[...]                                                     # (TS, dim)
        xq = jnp.dot(x, wq_ref[...], preferred_element_type=jnp.float32)  # (TS, H*D)
        xk = jnp.dot(x, wk_ref[...], preferred_element_type=jnp.float32)  # (TS, K*D)
        xv = jnp.dot(x, wv_ref[...], preferred_element_type=jnp.float32)  # (TS, K*D)
        if qk_norm:
            xq = _layernorm(xq, qg_ref[...], qb_ref[...])
            xk = _layernorm(xk, kg_ref[...], kb_ref[...])
        cos_t = cos_ref[...]                           # (TS, H*D): per-head [cos | cos]
        sin_t = sin_ref[...]                           # (TS, H*D): per-head [-sin | sin]
        q_ref[...] = (xq * cos_t
                      + _rotate_half(xq, head_dim) * sin_t).astype(q_ref.dtype)
        k_ref[...] = (xk * cos_t[:, :kw]
                      + _rotate_half(xk, head_dim) * sin_t[:, :kw]).astype(k_ref.dtype)
        v_ref[...] = xv.astype(v_ref.dtype)

    return kernel


# --------------------------------------------------------------------------- #
# Kernel A2: y -> yk, yv   (projection + optional LayerNorm, no rope, lane-dense)
# --------------------------------------------------------------------------- #
def _make_y_kv_kernel(qk_norm):
    def kernel(y_ref, wky_ref, wvy_ref, kyg_ref, kyb_ref, yk_ref, yv_ref):
        y = y_ref[...]                                                     # (Ly, y_dim)
        yk = jnp.dot(y, wky_ref[...], preferred_element_type=jnp.float32)
        yv = jnp.dot(y, wvy_ref[...], preferred_element_type=jnp.float32)
        if qk_norm:
            yk = _layernorm(yk, kyg_ref[...], kyb_ref[...])
        yk_ref[...] = yk.astype(yk_ref.dtype)
        yv_ref[...] = yv.astype(yv_ref.dtype)

    return kernel


# --------------------------------------------------------------------------- #
# Kernel B: flash-style self-attn (online softmax over KV tiles) + tanh-gated
# cross-attn + fused wo projection, accumulated over head groups.
# grid = (batch, q-tile, head-group) -> ("parallel", "parallel", "arbitrary")
# --------------------------------------------------------------------------- #
def _make_attention_kernel(head_dim, n_rep, group_heads, tk, nkv, compute_dtype):
    D = head_dim
    scale = 1.0 / math.sqrt(D)

    def kernel(q_ref, k_ref, v_ref, yk_ref, yv_ref, xb_ref, yb_ref, gate_ref,
               wo_ref, o_ref, acc_ref):
        g = pl.program_id(2)

        @pl.when(g == 0)
        def _():
            acc_ref[...] = jnp.zeros_like(acc_ref)

        tq = q_ref.shape[0]
        self_outs, cross_outs = [], []
        for r in range(group_heads):                       # static unroll over group
            q = q_ref[:, r * D:(r + 1) * D]                # (TQ, D)
            c0 = (r // n_rep) * D                          # lanes of the shared kv head

            # ---- self attention: online softmax over KV tiles ----------------
            def body(j, carry):
                m, l, acc = carry
                start = pl.multiple_of(j * tk, tk)
                kt = k_ref[pl.ds(start, tk), c0:c0 + D]    # (TK, D)
                vt = v_ref[pl.ds(start, tk), c0:c0 + D]    # (TK, D)
                s = jax.lax.dot_general(q, kt, (((1,), (1,)), ((), ())),
                                        preferred_element_type=jnp.float32)
                s = s * scale + xb_ref[:, pl.ds(start, tk)]        # additive f32 bias
                m_new = jnp.maximum(m, jnp.max(s, axis=-1, keepdims=True))
                alpha = jnp.exp(m - m_new)
                p = jnp.exp(s - m_new)
                l_new = alpha * l + jnp.sum(p, axis=-1, keepdims=True)
                acc_new = alpha * acc + jnp.dot(p.astype(compute_dtype), vt,
                                                preferred_element_type=jnp.float32)
                return m_new, l_new, acc_new

            m0 = jnp.full((tq, 1), NEG_INF, jnp.float32)
            l0 = jnp.zeros((tq, 1), jnp.float32)
            a0 = jnp.zeros((tq, D), jnp.float32)
            _, l, acc = jax.lax.fori_loop(0, nkv, body, (m0, l0, a0))
            self_outs.append(acc * _row_reciprocal(l))

            # ---- cross attention against y (Ly small -> single block) --------
            # TODO(synk): tile the y axis too if Ly ever grows beyond a few K tokens.
            ykt = yk_ref[:, c0:c0 + D]                     # (Ly, D)
            yvt = yv_ref[:, c0:c0 + D]
            sy = jax.lax.dot_general(q, ykt, (((1,), (1,)), ((), ())),
                                     preferred_element_type=jnp.float32)
            sy = sy * scale + yb_ref[...]
            sy = sy - jnp.max(sy, axis=-1, keepdims=True)
            py = jnp.exp(sy)
            oy = jnp.dot(py.astype(compute_dtype), yvt,
                         preferred_element_type=jnp.float32)
            cross_outs.append(oy * _row_reciprocal(jnp.sum(py, axis=-1, keepdims=True)))

        o_self = jnp.concatenate(self_outs, axis=-1)        # (TQ, GH*D)
        o_cross = jnp.concatenate(cross_outs, axis=-1)      # (TQ, GH*D)
        head_out = o_self + o_cross * gate_ref[...]         # gate: (1, GH*D), pre-tanh'd

        # fused wo projection over the whole head group (contraction width = GH*D)
        acc_ref[...] += jnp.dot(head_out.astype(compute_dtype), wo_ref[...],
                                preferred_element_type=jnp.float32)

        @pl.when(g == pl.num_programs(2) - 1)
        def _():
            o_ref[...] = acc_ref[...].astype(o_ref.dtype)

    return kernel


# --------------------------------------------------------------------------- #
# Wrapper
# --------------------------------------------------------------------------- #
def _half_split_perm(n_heads, head_dim):
    """Per-head permutation putting even feature indices first, odd second."""
    p = jnp.concatenate([jnp.arange(0, head_dim, 2), jnp.arange(1, head_dim, 2)])
    return (jnp.arange(n_heads)[:, None] * head_dim + p[None, :]).reshape(-1)


def _pick_tile(n, target, quantum=8):
    """Largest multiple of `quantum` that divides n and is <= target (else n)."""
    if n <= target:
        return n
    t = (target // quantum) * quantum
    while t >= quantum:
        if n % t == 0:
            return t
        t -= quantum
    return n


def _pick_kv_group(n_kv_heads, n_rep, head_dim, target_lanes=512):
    """# kv heads per Kernel-B step: widen the fused wo contraction toward
    `target_lanes` while keeping the per-group lane width (8,128)-legal."""
    g = max(1, min(n_kv_heads, target_lanes // max(1, n_rep * head_dim)))
    while n_kv_heads % g != 0:
        g -= 1
    if g != n_kv_heads and (g * head_dim) % 128 != 0:
        g = n_kv_heads
    return g


def attention_forward(x, x_mask, cos, sin, y, y_mask, params, *,
                      n_heads, n_kv_heads, head_dim, qk_norm=True,
                      compute_dtype=jnp.bfloat16):
    """x: (B,S,dim). x_mask: (B,S). cos/sin: (S, head_dim//2). y: (B,Ly,y_dim)."""
    B, S, dim = x.shape
    _, Ly, y_dim = y.shape
    H, K, D = n_heads, n_kv_heads, head_dim
    n_rep = H // K
    f32 = jnp.float32
    cdt = compute_dtype

    # ---- tiling decisions ----------------------------------------------------
    ts = _pick_tile(S, 512)                  # Kernel A seq tile
    tq = _pick_tile(S, 256)                  # Kernel B query tile
    tk = _pick_tile(S, 512)                  # Kernel B KV tile (in-kernel flash loop)
    nkv = S // tk
    nq = S // tq
    gkv = _pick_kv_group(K, n_rep, D)        # kv heads per head-group
    gh = gkv * n_rep                         # query heads per head-group
    ng = K // gkv                            # number of head groups

    # ---- one-time parameter layout glue --------------------------------------
    perm_q = _half_split_perm(H, D)
    perm_k = _half_split_perm(K, D)
    wq_t = params["wq"].T[:, perm_q].astype(cdt)          # (dim, H*D)
    wk_t = params["wk"].T[:, perm_k].astype(cdt)          # (dim, K*D)
    wv_t = params["wv"].T.astype(cdt)                     # (dim, K*D)
    wky_t = params["wk_y"].T[:, perm_k].astype(cdt)       # (y_dim, K*D)
    wvy_t = params["wv_y"].T.astype(cdt)                  # (y_dim, K*D)
    wo_g = params["wo"].T.reshape(ng, gh * D, dim).astype(cdt)   # per-group wo slabs
    qg = params["q_gamma"][perm_q].reshape(1, H * D).astype(f32)
    qb = params["q_beta"][perm_q].reshape(1, H * D).astype(f32)
    kg = params["k_gamma"][perm_k].reshape(1, K * D).astype(f32)
    kb = params["k_beta"][perm_k].reshape(1, K * D).astype(f32)
    kyg = params["ky_gamma"][perm_k].reshape(1, K * D).astype(f32)
    kyb = params["ky_beta"][perm_k].reshape(1, K * D).astype(f32)
    # tanh(gate) widened per head so it broadcasts against the (TQ, GH*D) group slab
    gate_w = jnp.repeat(jnp.tanh(params["gate"].astype(f32)), D).reshape(ng, 1, gh * D)
    # masks -> additive f32 biases (computed once, not per (batch, head) grid step)
    xbias = jnp.where(x_mask > 0, 0.0, NEG_INF).astype(f32).reshape(B, 1, S)
    ybias = jnp.where(y_mask > 0, 0.0, NEG_INF).astype(f32).reshape(B, 1, Ly)
    # RoPE tables tiled to full lane width: per head [cos | cos] and [-sin | sin]
    cos_t = jnp.tile(jnp.concatenate([cos, cos], axis=1).astype(f32), (1, H))   # (S,H*D)
    sin_t = jnp.tile(jnp.concatenate([-sin, sin], axis=1).astype(f32), (1, H))  # (S,H*D)
    x_c = x.astype(cdt)
    y_c = y.astype(cdt)

    # ---- Kernel A: qkv projection + qk-norm + rope (lane-dense outputs) ------
    # TODO(synk): for very large `dim`, tile the projection contraction with an
    # accumulator (LayerNorm over the full H*D features prevents feature tiling).
    q, k, v = pl.pallas_call(
        _make_qkv_rope_kernel(H, K, D, qk_norm),
        out_shape=(jax.ShapeDtypeStruct((B, S, H * D), cdt),
                   jax.ShapeDtypeStruct((B, S, K * D), cdt),
                   jax.ShapeDtypeStruct((B, S, K * D), cdt)),
        grid_spec=pltpu.PrefetchScalarGridSpec(
            num_scalar_prefetch=0,
            grid=(B, S // ts),
            in_specs=[
                pl.BlockSpec((None, ts, dim), lambda b, s: (b, s, 0)),
                pl.BlockSpec((dim, H * D), lambda b, s: (0, 0)),
                pl.BlockSpec((dim, K * D), lambda b, s: (0, 0)),
                pl.BlockSpec((dim, K * D), lambda b, s: (0, 0)),
                pl.BlockSpec((1, H * D), lambda b, s: (0, 0)),
                pl.BlockSpec((1, H * D), lambda b, s: (0, 0)),
                pl.BlockSpec((1, K * D), lambda b, s: (0, 0)),
                pl.BlockSpec((1, K * D), lambda b, s: (0, 0)),
                pl.BlockSpec((ts, H * D), lambda b, s: (s, 0)),
                pl.BlockSpec((ts, H * D), lambda b, s: (s, 0)),
            ],
            out_specs=(
                pl.BlockSpec((None, ts, H * D), lambda b, s: (b, s, 0)),
                pl.BlockSpec((None, ts, K * D), lambda b, s: (b, s, 0)),
                pl.BlockSpec((None, ts, K * D), lambda b, s: (b, s, 0)),
            )),
        compiler_params=pltpu.CompilerParams(
            dimension_semantics=("parallel", "parallel"),
            vmem_limit_bytes=VMEM_LIMIT),
    )(x_c, wq_t, wk_t, wv_t, qg, qb, kg, kb, cos_t, sin_t)

    # ---- Kernel A2: y-path kv projection --------------------------------------
    yk, yv = pl.pallas_call(
        _make_y_kv_kernel(qk_norm),
        out_shape=(jax.ShapeDtypeStruct((B, Ly, K * D), cdt),
                   jax.ShapeDtypeStruct((B, Ly, K * D), cdt)),
        grid_spec=pltpu.PrefetchScalarGridSpec(
            num_scalar_prefetch=0,
            grid=(B,),
            in_specs=[
                pl.BlockSpec((None, Ly, y_dim), lambda b: (b, 0, 0)),
                pl.BlockSpec((y_dim, K * D), lambda b: (0, 0)),
                pl.BlockSpec((y_dim, K * D), lambda b: (0, 0)),
                pl.BlockSpec((1, K * D), lambda b: (0, 0)),
                pl.BlockSpec((1, K * D), lambda b: (0, 0)),
            ],
            out_specs=(
                pl.BlockSpec((None, Ly, K * D), lambda b: (b, 0, 0)),
                pl.BlockSpec((None, Ly, K * D), lambda b: (b, 0, 0)),
            )),
        compiler_params=pltpu.CompilerParams(
            dimension_semantics=("parallel",),
            vmem_limit_bytes=VMEM_LIMIT),
    )(y_c, wky_t, wvy_t, kyg, kyb)

    # ---- Kernel B: flash dual attention + gate + fused wo ---------------------
    # TODO(synk): try pre-transposed K (D, S) slabs from Kernel A if lower_as_mlir
    # shows Mosaic inserting a vxpose for the q.k^T contraction.
    itemsize = jnp.dtype(cdt).itemsize
    flops = int(B * H * (4 * S * S * D + 4 * S * Ly * D) + 2 * B * S * H * D * dim)
    transcendentals = int(B * H * S * (S + Ly))
    bytes_accessed = int(
        itemsize * (B * S * H * D + 2 * B * nq * S * K * D + 2 * B * nq * Ly * K * D
                    + B * nq * H * D * dim)
        + 4 * B * S * dim + 8 * B * (S + Ly))

    out = pl.pallas_call(
        _make_attention_kernel(D, n_rep, gh, tk, nkv, cdt),
        out_shape=jax.ShapeDtypeStruct((B, S, dim), x.dtype),
        grid_spec=pltpu.PrefetchScalarGridSpec(
            num_scalar_prefetch=0,
            grid=(B, nq, ng),
            in_specs=[
                pl.BlockSpec((None, tq, gh * D), lambda b, qi, g: (b, qi, g)),    # q
                pl.BlockSpec((None, S, gkv * D), lambda b, qi, g: (b, 0, g)),     # k
                pl.BlockSpec((None, S, gkv * D), lambda b, qi, g: (b, 0, g)),     # v
                pl.BlockSpec((None, Ly, gkv * D), lambda b, qi, g: (b, 0, g)),    # yk
                pl.BlockSpec((None, Ly, gkv * D), lambda b, qi, g: (b, 0, g)),    # yv
                pl.BlockSpec((None, 1, S), lambda b, qi, g: (b, 0, 0)),           # x bias
                pl.BlockSpec((None, 1, Ly), lambda b, qi, g: (b, 0, 0)),          # y bias
                pl.BlockSpec((None, 1, gh * D), lambda b, qi, g: (g, 0, 0)),      # tanh(gate)
                pl.BlockSpec((None, gh * D, dim), lambda b, qi, g: (g, 0, 0)),    # wo slab
            ],
            out_specs=pl.BlockSpec((None, tq, dim), lambda b, qi, g: (b, qi, 0)),
            scratch_shapes=[pltpu.VMEM((tq, dim), jnp.float32)]),
        compiler_params=pltpu.CompilerParams(
            dimension_semantics=("parallel", "parallel", "arbitrary"),
            vmem_limit_bytes=VMEM_LIMIT),
        cost_estimate=pl.CostEstimate(flops=flops, transcendentals=transcendentals,
                                      bytes_accessed=bytes_accessed),
    )(q, k, v, yk, yv, xbias, ybias, gate_w, wo_g)
    return out


# --------------------------------------------------------------------------- #
# Pure-JAX reference mirroring the PyTorch module's (non-flash, fp32) forward.
# --------------------------------------------------------------------------- #
def _reference(x, x_mask, cos, sin, y, y_mask, params, *,
               n_heads, n_kv_heads, head_dim, qk_norm=True):
    B, S, dim = x.shape
    _, Ly, _ = y.shape
    H, K, D = n_heads, n_kv_heads, head_dim
    n_rep = H // K
    prec = jax.lax.Precision.HIGHEST

    def ln(z, g, b):
        m = z.mean(-1, keepdims=True)
        zc = z - m
        v = (zc * zc).mean(-1, keepdims=True)
        return zc * jax.lax.rsqrt(v + LN_EPS) * g + b

    xq = jnp.einsum("bsd,ed->bse", x, params["wq"], precision=prec)
    xk = jnp.einsum("bsd,ed->bse", x, params["wk"], precision=prec)
    xv = jnp.einsum("bsd,ed->bse", x, params["wv"], precision=prec)
    if qk_norm:
        xq = ln(xq, params["q_gamma"], params["q_beta"])
        xk = ln(xk, params["k_gamma"], params["k_beta"])
    xq = xq.reshape(B, S, H, D)
    xk = xk.reshape(B, S, K, D)
    xv = xv.reshape(B, S, K, D)

    def rope(t):
        t2 = t.reshape(t.shape[:-1] + (D // 2, 2))
        re, im = t2[..., 0], t2[..., 1]
        c = cos[None, :, None, :]
        s_ = sin[None, :, None, :]
        return jnp.stack([re * c - im * s_, re * s_ + im * c], axis=-1).reshape(t.shape)

    xq, xk = rope(xq), rope(xk)
    scale = 1.0 / math.sqrt(D)

    xk_r = jnp.repeat(xk, n_rep, axis=2)
    xv_r = jnp.repeat(xv, n_rep, axis=2)
    s = jnp.einsum("bqhd,bkhd->bhqk", xq, xk_r, precision=prec) * scale
    s = s + jnp.where(x_mask[:, None, None, :] > 0, 0.0, NEG_INF)
    o = jnp.einsum("bhqk,bkhd->bqhd", jax.nn.softmax(s, axis=-1), xv_r, precision=prec)

    yk = jnp.einsum("bld,ed->ble", y, params["wk_y"], precision=prec)
    yv = jnp.einsum("bld,ed->ble", y, params["wv_y"], precision=prec)
    if qk_norm:
        yk = ln(yk, params["ky_gamma"], params["ky_beta"])
    yk = jnp.repeat(yk.reshape(B, Ly, K, D), n_rep, axis=2)
    yv = jnp.repeat(yv.reshape(B, Ly, K, D), n_rep, axis=2)
    sy = jnp.einsum("bqhd,bkhd->bhqk", xq, yk, precision=prec) * scale
    sy = sy + jnp.where(y_mask[:, None, None, :] > 0, 0.0, NEG_INF)
    oy = jnp.einsum("bhqk,bkhd->bqhd", jax.nn.softmax(sy, axis=-1), yv, precision=prec)

    o = o + oy * jnp.tanh(params["gate"])[None, None, :, None]
    return jnp.einsum("bse,de->bsd", o.reshape(B, S, H * D), params["wo"], precision=prec)


if __name__ == "__main__":
    # Small shapes consistent with the module: dim=32, 4 heads (head_dim=8),
    # seqlen=16, y sequence length=8, y_dim=16, qk_norm=True.
    B, S, dim = 2, 16, 32
    n_heads, n_kv_heads = 4, 4
    head_dim = dim // n_heads
    y_dim, Ly = 16, 8
    qk_norm = True
    H, K, D = n_heads, n_kv_heads, head_dim

    key = jax.random.PRNGKey(0)
    keys = jax.random.split(key, 16)
    f32 = jnp.float32

    x = jax.random.normal(keys[0], (B, S, dim), f32)
    y = jax.random.normal(keys[1], (B, Ly, y_dim), f32)
    x_mask = jnp.ones((B, S), f32).at[1, -3:].set(0.0)   # pad out 3 tokens of batch 1
    y_mask = jnp.ones((B, Ly), f32).at[1, -2:].set(0.0)

    def lin(kk, out_f, in_f):
        bound = 1.0 / math.sqrt(in_f)
        return jax.random.uniform(kk, (out_f, in_f), f32, -bound, bound)

    params = {
        "wq": lin(keys[2], H * D, dim),
        "wk": lin(keys[3], K * D, dim),
        "wv": lin(keys[4], K * D, dim),
        "wk_y": lin(keys[5], K * D, y_dim),
        "wv_y": lin(keys[6], K * D, y_dim),
        "wo": lin(keys[7], dim, H * D),
        # module inits gate to zeros (tanh=0 gates the y-branch off); use nonzero
        # values here so the cross-attention path is actually exercised.
        "gate": 0.5 * jax.random.normal(keys[8], (H,), f32),
        "q_gamma": 1.0 + 0.1 * jax.random.normal(keys[9], (H * D,), f32),
        "q_beta": 0.1 * jax.random.normal(keys[10], (H * D,), f32),
        "k_gamma": 1.0 + 0.1 * jax.random.normal(keys[11], (K * D,), f32),
        "k_beta": 0.1 * jax.random.normal(keys[12], (K * D,), f32),
        "ky_gamma": 1.0 + 0.1 * jax.random.normal(keys[13], (K * D,), f32),
        "ky_beta": 0.1 * jax.random.normal(keys[14], (K * D,), f32),
    }

    # Rotary tables (freqs_cis split into cos/sin), shape (S, head_dim//2).
    inv_freq = 1.0 / (10000.0 ** (jnp.arange(0, D, 2, dtype=f32) / D))
    ang = jnp.arange(S, dtype=f32)[:, None] * inv_freq[None, :]
    cos, sin = jnp.cos(ang), jnp.sin(ang)

    ref = _reference(x, x_mask, cos, sin, y, y_mask, params,
                     n_heads=H, n_kv_heads=K, head_dim=D, qk_norm=qk_norm)

    # f32 compute path: tight validation of the kernel math.
    out_f32 = attention_forward(x, x_mask, cos, sin, y, y_mask, params,
                                n_heads=H, n_kv_heads=K, head_dim=D,
                                qk_norm=qk_norm, compute_dtype=jnp.float32)
    out_f32 = jax.block_until_ready(out_f32)
    assert out_f32.shape == (B, S, dim)
    diff32 = float(jnp.max(jnp.abs(out_f32 - ref)))
    assert diff32 < 5e-3, f"f32 path mismatch vs reference (max |diff| = {diff32})"

    # bf16 compute path (production config per perf review): looser tolerance.
    out_bf16 = attention_forward(x, x_mask, cos, sin, y, y_mask, params,
                                 n_heads=H, n_kv_heads=K, head_dim=D,
                                 qk_norm=qk_norm, compute_dtype=jnp.bfloat16)
    out_bf16 = jax.block_until_ready(out_bf16)
    assert out_bf16.shape == (B, S, dim)
    diff16 = float(jnp.max(jnp.abs(out_bf16 - ref)))
    assert diff16 < 5e-2, f"bf16 path mismatch vs reference (max |diff| = {diff16})"

    print("KERNEL_OK")
</pallas_src>

<mosaic_0001>
module attributes {stable_mosaic.version = 11 : i64} {
  func.func @kernel(%arg0: i32, %arg1: i32, %arg2: memref<1x16x32xf32, #tpu.memory_space<vmem>>, %arg3: memref<32x32xf32, #tpu.memory_space<vmem>>, %arg4: memref<32x32xf32, #tpu.memory_space<vmem>>, %arg5: memref<32x32xf32, #tpu.memory_space<vmem>>, %arg6: memref<1x32xf32, #tpu.memory_space<vmem>>, %arg7: memref<1x32xf32, #tpu.memory_space<vmem>>, %arg8: memref<1x32xf32, #tpu.memory_space<vmem>>, %arg9: memref<1x32xf32, #tpu.memory_space<vmem>>, %arg10: memref<16x32xf32, #tpu.memory_space<vmem>>, %arg11: memref<16x32xf32, #tpu.memory_space<vmem>>, %arg12: memref<1x16x32xf32, #tpu.memory_space<vmem>>, %arg13: memref<1x16x32xf32, #tpu.memory_space<vmem>>, %arg14: memref<1x16x32xf32, #tpu.memory_space<vmem>>) attributes {dimension_semantics = [#tpu.dimension_semantics<parallel>, #tpu.dimension_semantics<parallel>], iteration_bounds = array<i64: 2, 1>, scalar_prefetch = 0 : i64, scratch_operands = 0 : i64, tpu.core_type = #tpu.core_type<tc>, window_params = [{transform_indices = @transform_0, window_bounds = array<i64: 1, 16, 32>}, {pipeline_mode = #tpu.pipeline_mode<synchronous>, transform_indices = @transform_1, window_bounds = array<i64: 32, 32>}, {pipeline_mode = #tpu.pipeline_mode<synchronous>, transform_indices = @transform_2, window_bounds = array<i64: 32, 32>}, {pipeline_mode = #tpu.pipeline_mode<synchronous>, transform_indices = @transform_3, window_bounds = array<i64: 32, 32>}, {pipeline_mode = #tpu.pipeline_mode<synchronous>, transform_indices = @transform_4, window_bounds = array<i64: 1, 32>}, {pipeline_mode = #tpu.pipeline_mode<synchronous>, transform_indices = @transform_5, window_bounds = array<i64: 1, 32>}, {pipeline_mode = #tpu.pipeline_mode<synchronous>, transform_indices = @transform_6, window_bounds = array<i64: 1, 32>}, {pipeline_mode = #tpu.pipeline_mode<synchronous>, transform_indices = @transform_7, window_bounds = array<i64: 1, 32>}, {transform_indices = @transform_8, window_bounds = array<i64: 16, 32>}, {transform_indices = @transform_9, window_bounds = array<i64: 16, 32>}, {transform_indices = @transform_10, window_bounds = array<i64: 1, 16, 32>}, {transform_indices = @transform_11, window_bounds = array<i64: 1, 16, 32>}, {transform_indices = @transform_12, window_bounds = array<i64: 1, 16, 32>}]} {
    %c0 = arith.constant 0 : index
    %c0_0 = arith.constant 0 : index
    %c0_1 = arith.constant 0 : index
    %0 = vector.load %arg2[%c0, %c0_0, %c0_1] : memref<1x16x32xf32, #tpu.memory_space<vmem>>, vector<1x16x32xf32>
    %1 = vector.shape_cast %0 : vector<1x16x32xf32> to vector<16x32xf32>
    %c0_2 = arith.constant 0 : index
    %c0_3 = arith.constant 0 : index
    %2 = vector.load %arg3[%c0_2, %c0_3] : memref<32x32xf32, #tpu.memory_space<vmem>>, vector<32x32xf32>
    %cst = arith.constant dense<0.000000e+00> : vector<16x32xf32>
    %3 = tpu.matmul %1, %2, %cst {dimension_numbers = #tpu.dot_dimension_numbers<[1], [0], [0], [1], [0, 0, 1, 1], [], []>} : vector<16x32xf32>, vector<32x32xf32>, vector<16x32xf32> -> vector<16x32xf32>
    %c0_4 = arith.constant 0 : index
    %c0_5 = arith.constant 0 : index
    %4 = vector.load %arg4[%c0_4, %c0_5] : memref<32x32xf32, #tpu.memory_space<vmem>>, vector<32x32xf32>
    %cst_6 = arith.constant dense<0.000000e+00> : vector<16x32xf32>
    %5 = tpu.matmul %1, %4, %cst_6 {dimension_numbers = #tpu.dot_dimension_numbers<[1], [0], [0], [1], [0, 0, 1, 1], [], []>} : vector<16x32xf32>, vector<32x32xf32>, vector<16x32xf32> -> vector<16x32xf32>
    %c0_7 = arith.constant 0 : index
    %c0_8 = arith.constant 0 : index
    %6 = vector.load %arg5[%c0_7, %c0_8] : memref<32x32xf32, #tpu.memory_space<vmem>>, vector<32x32xf32>
    %cst_9 = arith.constant dense<0.000000e+00> : vector<16x32xf32>
    %7 = tpu.matmul %1, %6, %cst_9 {dimension_numbers = #tpu.dot_dimension_numbers<[1], [0], [0], [1], [0, 0, 1, 1], [], []>} : vector<16x32xf32>, vector<32x32xf32>, vector<16x32xf32> -> vector<16x32xf32>
    %c0_10 = arith.constant 0 : index
    %c0_11 = arith.constant 0 : index
    %8 = vector.load %arg6[%c0_10, %c0_11] : memref<1x32xf32, #tpu.memory_space<vmem>>, vector<1x32xf32>
    %c0_12 = arith.constant 0 : index
    %c0_13 = arith.constant 0 : index
    %9 = vector.load %arg7[%c0_12, %c0_13] : memref<1x32xf32, #tpu.memory_space<vmem>>, vector<1x32xf32>
    %cst_14 = arith.constant dense<0.000000e+00> : vector<16xf32>
    %10 = vector.multi_reduction <add>, %3, %cst_14 [1] : vector<16x32xf32> to vector<16xf32>
    %11 = vector.shape_cast %10 : vector<16xf32> to vector<16x1xf32>
    %cst_15 = arith.constant 3.200000e+01 : f32
    %12 = vector.broadcast %cst_15 : f32 to vector<16x1xf32>
    %13 = arith.divf %11, %12 : vector<16x1xf32>
    %14 = vector.broadcast %13 : vector<16x1xf32> to vector<16x32xf32>
    %15 = arith.subf %3, %14 : vector<16x32xf32>
    %16 = arith.mulf %15, %15 : vector<16x32xf32>
    %cst_16 = arith.constant dense<0.000000e+00> : vector<16xf32>
    %17 = vector.multi_reduction <add>, %16, %cst_16 [1] : vector<16x32xf32> to vector<16xf32>
    %18 = vector.shape_cast %17 : vector<16xf32> to vector<16x1xf32>
    %cst_17 = arith.constant 3.200000e+01 : f32
    %19 = vector.broadcast %cst_17 : f32 to vector<16x1xf32>
    %20 = arith.divf %18, %19 : vector<16x1xf32>
    %cst_18 = arith.constant 9.99999974E-6 : f32
    %21 = vector.broadcast %cst_18 : f32 to vector<16x1xf32>
    %22 = arith.addf %20, %21 : vector<16x1xf32>
    %23 = math.rsqrt %22 : vector<16x1xf32>
    %24 = vector.broadcast %23 : vector<16x1xf32> to vector<16x32xf32>
    %25 = arith.mulf %15, %24 : vector<16x32xf32>
    %26 = vector.broadcast %8 : vector<1x32xf32> to vector<16x32xf32>
    %27 = arith.mulf %25, %26 : vector<16x32xf32>
    %28 = vector.broadcast %9 : vector<1x32xf32> to vector<16x32xf32>
    %29 = arith.addf %27, %28 : vector<16x32xf32>
    %c0_19 = arith.constant 0 : index
    %c0_20 = arith.constant 0 : index
    %30 = vector.load %arg8[%c0_19, %c0_20] : memref<1x32xf32, #tpu.memory_space<vmem>>, vector<1x32xf32>
    %c0_21 = arith.constant 0 : index
    %c0_22 = arith.constant 0 : index
    %31 = vector.load %arg9[%c0_21, %c0_22] : memref<1x32xf32, #tpu.memory_space<vmem>>, vector<1x32xf32>
    %cst_23 = arith.constant dense<0.000000e+00> : vector<16xf32>
    %32 = vector.multi_reduction <add>, %5, %cst_23 [1] : vector<16x32xf32> to vector<16xf32>
    %33 = vector.shape_cast %32 : vector<16xf32> to vector<16x1xf32>
    %cst_24 = arith.constant 3.200000e+01 : f32
    %34 = vector.broadcast %cst_24 : f32 to vector<16x1xf32>
    %35 = arith.divf %33, %34 : vector<16x1xf32>
    %36 = vector.broadcast %35 : vector<16x1xf32> to vector<16x32xf32>
    %37 = arith.subf %5, %36 : vector<16x32xf32>
    %38 = arith.mulf %37, %37 : vector<16x32xf32>
    %cst_25 = arith.constant dense<0.000000e+00> : vector<16xf32>
    %39 = vector.multi_reduction <add>, %38, %cst_25 [1] : vector<16x32xf32> to vector<16xf32>
    %40 = vector.shape_cast %39 : vector<16xf32> to vector<16x1xf32>
    %cst_26 = arith.constant 3.200000e+01 : f32
    %41 = vector.broadcast %cst_26 : f32 to vector<16x1xf32>
    %42 = arith.divf %40, %41 : vector<16x1xf32>
    %cst_27 = arith.constant 9.99999974E-6 : f32
    %43 = vector.broadcast %cst_27 : f32 to vector<16x1xf32>
    %44 = arith.addf %42, %43 : vector<16x1xf32>
    %45 = math.rsqrt %44 : vector<16x1xf32>
    %46 = vector.broadcast %45 : vector<16x1xf32> to vector<16x32xf32>
    %47 = arith.mulf %37, %46 : vector<16x32xf32>
    %48 = vector.broadcast %30 : vector<1x32xf32> to vector<16x32xf32>
    %49 = arith.mulf %47, %48 : vector<16x32xf32>
    %50 = vector.broadcast %31 : vector<1x32xf32> to vector<16x32xf32>
    %51 = arith.addf %49, %50 : vector<16x32xf32>
    %c0_28 = arith.constant 0 : index
    %c0_29 = arith.constant 0 : index
    %52 = vector.load %arg10[%c0_28, %c0_29] : memref<16x32xf32, #tpu.memory_space<vmem>>, vector<16x32xf32>
    %c0_30 = arith.constant 0 : index
    %c0_31 = arith.constant 0 : index
    %53 = vector.load %arg11[%c0_30, %c0_31] : memref<16x32xf32, #tpu.memory_space<vmem>>, vector<16x32xf32>
    %54 = arith.mulf %29, %52 : vector<16x32xf32>
    %55 = vector.extract_strided_slice %29 {offsets = [0, 4], sizes = [16, 28], strides = [1, 1]} : vector<16x32xf32> to vector<16x28xf32>
    %56 = vector.extract_strided_slice %29 {offsets = [0, 0], sizes = [16, 4], strides = [1, 1]} : vector<16x32xf32> to vector<16x4xf32>
    %57 = tpu.concatenate %55, %56 in 1 : vector<16x28xf32>, vector<16x4xf32> -> vector<16x32xf32>
    %58 = vector.extract_strided_slice %29 {offsets = [0, 28], sizes = [16, 4], strides = [1, 1]} : vector<16x32xf32> to vector<16x4xf32>
    %59 = vector.extract_strided_slice %29 {offsets = [0, 0], sizes = [16, 28], strides = [1, 1]} : vector<16x32xf32> to vector<16x28xf32>
    %60 = tpu.concatenate %58, %59 in 1 : vector<16x4xf32>, vector<16x28xf32> -> vector<16x32xf32>
    %61 = tpu.iota {dimensions = array<i32: 1>} : vector<16x32xi32>
    %c8_i32 = arith.constant 8 : i32
    %c0_i32 = arith.constant 0 : i32
    %62 = arith.cmpi eq, %c8_i32, %c0_i32 : i32
    %c1_i32 = arith.constant 1 : i32
    %63 = arith.select %62, %c1_i32, %c8_i32 : i32
    %64 = vector.broadcast %63 : i32 to vector<16x32xi32>
    %65 = arith.remsi %61, %64 : vector<16x32xi32>
    %c0_i32_32 = arith.constant 0 : i32
    %66 = vector.broadcast %c0_i32_32 : i32 to vector<16x32xi32>
    %67 = arith.cmpi ne, %65, %66 : vector<16x32xi32>
    %c0_i32_33 = arith.constant 0 : i32
    %68 = vector.broadcast %c0_i32_33 : i32 to vector<16x32xi32>
    %69 = arith.cmpi slt, %65, %68 : vector<16x32xi32>
    %c0_i32_34 = arith.constant 0 : i32
    %70 = arith.cmpi slt, %63, %c0_i32_34 : i32
    %71 = vector.broadcast %70 : i1 to vector<16x32xi1>
    %72 = vector.broadcast %71 : vector<16x32xi1> to vector<16x32xi1>
    %73 = arith.xori %69, %72 : vector<16x32xi1>
    %74 = arith.andi %73, %67 : vector<16x32xi1>
    %75 = vector.broadcast %63 : i32 to vector<16x32xi32>
    %76 = arith.addi %65, %75 : vector<16x32xi32>
    %77 = arith.select %74, %76, %65 : vector<16x32xi1>, vector<16x32xi32>
    %c4_i32 = arith.constant 4 : i32
    %78 = vector.broadcast %c4_i32 : i32 to vector<16x32xi32>
    %79 = arith.cmpi slt, %77, %78 : vector<16x32xi32>
    %80 = arith.select %79, %57, %60 : vector<16x32xi1>, vector<16x32xf32>
    %81 = arith.mulf %80, %53 : vector<16x32xf32>
    %82 = arith.addf %54, %81 : vector<16x32xf32>
    %c0_35 = arith.constant 0 : index
    %c0_36 = arith.constant 0 : index
    %c0_37 = arith.constant 0 : index
    %83 = vector.load %arg12[%c0_35, %c0_36, %c0_37] : memref<1x16x32xf32, #tpu.memory_space<vmem>>, vector<1x16x32xf32>
    %84 = vector.shape_cast %83 : vector<1x16x32xf32> to vector<16x32xf32>
    %85 = vector.shape_cast %82 : vector<16x32xf32> to vector<1x16x32xf32>
    tpu.vector_store %arg12[%c0_35, %c0_36, %c0_37], %85 {strides = array<i32>} : memref<1x16x32xf32, #tpu.memory_space<vmem>>, vector<1x16x32xf32>,
    %86 = arith.mulf %51, %52 : vector<16x32xf32>
    %87 = vector.extract_strided_slice %51 {offsets = [0, 4], sizes = [16, 28], strides = [1, 1]} : vector<16x32xf32> to vector<16x28xf32>
    %88 = vector.extract_strided_slice %51 {offsets = [0, 0], sizes = [16, 4], strides = [1, 1]} : vector<16x32xf32> to vector<16x4xf32>
    %89 = tpu.concatenate %87, %88 in 1 : vector<16x28xf32>, vector<16x4xf32> -> vector<16x32xf32>
    %90 = vector.extract_strided_slice %51 {offsets = [0, 28], sizes = [16, 4], strides = [1, 1]} : vector<16x32xf32> to vector<16x4xf32>
    %91 = vector.extract_strided_slice %51 {offsets = [0, 0], sizes = [16, 28], strides = [1, 1]} : vector<16x32xf32> to vector<16x28xf32>
    %92 = tpu.concatenate %90, %91 in 1 : vector<16x4xf32>, vector<16x28xf32> -> vector<16x32xf32>
    %93 = tpu.iota {dimensions = array<i32: 1>} : vector<16x32xi32>
    %c8_i32_38 = arith.constant 8 : i32
    %c0_i32_39 = arith.constant 0 : i32
    %94 = arith.cmpi eq, %c8_i32_38, %c0_i32_39 : i32
    %c1_i32_40 = arith.constant 1 : i32
    %95 = arith.select %94, %c1_i32_40, %c8_i32_38 : i32
    %96 = vector.broadcast %95 : i32 to vector<16x32xi32>
    %97 = arith.remsi %93, %96 : vector<16x32xi32>
    %c0_i32_41 = arith.constant 0 : i32
    %98 = vector.broadcast %c0_i32_41 : i32 to vector<16x32xi32>
    %99 = arith.cmpi ne, %97, %98 : vector<16x32xi32>
    %c0_i32_42 = arith.constant 0 : i32
    %100 = vector.broadcast %c0_i32_42 : i32 to vector<16x32xi32>
    %101 = arith.cmpi slt, %97, %100 : vector<16x32xi32>
    %c0_i32_43 = arith.constant 0 : i32
    %102 = arith.cmpi slt, %95, %c0_i32_43 : i32
    %103 = vector.broadcast %102 : i1 to vector<16x32xi1>
    %104 = vector.broadcast %103 : vector<16x32xi1> to vector<16x32xi1>
    %105 = arith.xori %101, %104 : vector<16x32xi1>
    %106 = arith.andi %105, %99 : vector<16x32xi1>
    %107 = vector.broadcast %95 : i32 to vector<16x32xi32>
    %108 = arith.addi %97, %107 : vector<16x32xi32>
    %109 = arith.select %106, %108, %97 : vector<16x32xi1>, vector<16x32xi32>
    %c4_i32_44 = arith.constant 4 : i32
    %110 = vector.broadcast %c4_i32_44 : i32 to vector<16x32xi32>
    %111 = arith.cmpi slt, %109, %110 : vector<16x32xi32>
    %112 = arith.select %111, %89, %92 : vector<16x32xi1>, vector<16x32xf32>
    %113 = arith.mulf %112, %53 : vector<16x32xf32>
    %114 = arith.addf %86, %113 : vector<16x32xf32>
    %c0_45 = arith.constant 0 : index
    %c0_46 = arith.constant 0 : index
    %c0_47 = arith.constant 0 : index
    %115 = vector.load %arg13[%c0_45, %c0_46, %c0_47] : memref<1x16x32xf32, #tpu.memory_space<vmem>>, vector<1x16x32xf32>
    %116 = vector.shape_cast %115 : vector<1x16x32xf32> to vector<16x32xf32>
    %117 = vector.shape_cast %114 : vector<16x32xf32> to vector<1x16x32xf32>
    tpu.vector_store %arg13[%c0_45, %c0_46, %c0_47], %117 {strides = array<i32>} : memref<1x16x32xf32, #tpu.memory_space<vmem>>, vector<1x16x32xf32>,
    %c0_48 = arith.constant 0 : index
    %c0_49 = arith.constant 0 : index
    %c0_50 = arith.constant 0 : index
    %118 = vector.load %arg14[%c0_48, %c0_49, %c0_50] : memref<1x16x32xf32, #tpu.memory_space<vmem>>, vector<1x16x32xf32>
    %119 = vector.shape_cast %118 : vector<1x16x32xf32> to vector<16x32xf32>
    %120 = vector.shape_cast %7 : vector<16x32xf32> to vector<1x16x32xf32>
    tpu.vector_store %arg14[%c0_48, %c0_49, %c0_50], %120 {strides = array<i32>} : memref<1x16x32xf32, #tpu.memory_space<vmem>>, vector<1x16x32xf32>,
    return
  }
  func.func @transform_0(%arg0: i32, %arg1: i32) -> (i32, i32, i32) {
    %c0_i32 = arith.constant 0 : i32
    %c0_i32_0 = arith.constant 0 : i32
    return %arg0, %arg1, %c0_i32 : i32, i32, i32
  }
  func.func @transform_1(%arg0: i32, %arg1: i32) -> (i32, i32) {
    %c0_i32 = arith.constant 0 : i32
    %c0_i32_0 = arith.constant 0 : i32
    %c0_i32_1 = arith.constant 0 : i32
    return %c0_i32, %c0_i32_0 : i32, i32
  }
  func.func @transform_2(%arg0: i32, %arg1: i32) -> (i32, i32) {
    %c0_i32 = arith.constant 0 : i32
    %c0_i32_0 = arith.constant 0 : i32
    %c0_i32_1 = arith.constant 0 : i32
    return %c0_i32, %c0_i32_0 : i32, i32
  }
  func.func @transform_3(%arg0: i32, %arg1: i32) -> (i32, i32) {
    %c0_i32 = arith.constant 0 : i32
    %c0_i32_0 = arith.constant 0 : i32
    %c0_i32_1 = arith.constant 0 : i32
    return %c0_i32, %c0_i32_0 : i32, i32
  }
  func.func @transform_4(%arg0: i32, %arg1: i32) -> (i32, i32) {
    %c0_i32 = arith.constant 0 : i32
    %c0_i32_0 = arith.constant 0 : i32
    %c0_i32_1 = arith.constant 0 : i32
    return %c0_i32, %c0_i32_0 : i32, i32
  }
  func.func @transform_5(%arg0: i32, %arg1: i32) -> (i32, i32) {
    %c0_i32 = arith.constant 0 : i32
    %c0_i32_0 = arith.constant 0 : i32
    %c0_i32_1 = arith.constant 0 : i32
    return %c0_i32, %c0_i32_0 : i32, i32
  }
  func.func @transform_6(%arg0: i32, %arg1: i32) -> (i32, i32) {
    %c0_i32 = arith.constant 0 : i32
    %c0_i32_0 = arith.constant 0 : i32
    %c0_i32_1 = arith.constant 0 : i32
    return %c0_i32, %c0_i32_0 : i32, i32
  }
  func.func @transform_7(%arg0: i32, %arg1: i32) -> (i32, i32) {
    %c0_i32 = arith.constant 0 : i32
    %c0_i32_0 = arith.constant 0 : i32
    %c0_i32_1 = arith.constant 0 : i32
    return %c0_i32, %c0_i32_0 : i32, i32
  }
  func.func @transform_8(%arg0: i32, %arg1: i32) -> (i32, i32) {
    %c0_i32 = arith.constant 0 : i32
    %c0_i32_0 = arith.constant 0 : i32
    return %arg1, %c0_i32 : i32, i32
  }
  func.func @transform_9(%arg0: i32, %arg1: i32) -> (i32, i32) {
    %c0_i32 = arith.constant 0 : i32
    %c0_i32_0 = arith.constant 0 : i32
    return %arg1, %c0_i32 : i32, i32
  }
  func.func @transform_10(%arg0: i32, %arg1: i32) -> (i32, i32, i32) {
    %c0_i32 = arith.constant 0 : i32
    %c0_i32_0 = arith.constant 0 : i32
    return %arg0, %arg1, %c0_i32 : i32, i32, i32
  }
  func.func @transform_11(%arg0: i32, %arg1: i32) -> (i32, i32, i32) {
    %c0_i32 = arith.constant 0 : i32
    %c0_i32_0 = arith.constant 0 : i32
    return %arg0, %arg1, %c0_i32 : i32, i32, i32
  }
  func.func @transform_12(%arg0: i32, %arg1: i32) -> (i32, i32, i32) {
    %c0_i32 = arith.constant 0 : i32
    %c0_i32_0 = arith.constant 0 : i32
    return %arg0, %arg1, %c0_i32 : i32, i32, i32
  }
}

</mosaic_0001>

<bundles_post_ra>
// kernel: tpu_custom_call.1
= control target key start
LH: loop header
LB: loop body
LE: loop exit
PB: predicated region body
PF: predicated region fallthrough
CT: control target
= control target key end

     0   :  { %s2169_s0 = inlined_call_operand.hbm [shape: f32[2,16,32], index: 0, kind: input, shape index: {}]   ;;  %s2170_s1 = inlined_call_operand.hbm [shape: f32[32,32], index: 1, kind: input, shape index: {}]   ;;  %s2171_s2 = inlined_call_operand.hbm [shape: f32[32,32], index: 2, kind: input, shape index: {}]   ;;  %s2172_s3 = inlined_call_operand.hbm [shape: f32[32,32], index: 3, kind: input, shape index: {}]   ;;  %s2173_s4 = inlined_call_operand.vmem [shape: f32[1,32], index: 4, kind: input, shape index: {}]   ;;  %s2174_s5 = inlined_call_operand.vmem [shape: f32[1,32], index: 5, kind: input, shape index: {}]   ;;  %s2175_s6 = inlined_call_operand.vmem [shape: f32[1,32], index: 6, kind: input, shape index: {}]   ;;  %s2176_s7 = inlined_call_operand.vmem [shape: f32[1,32], index: 7, kind: input, shape index: {}]   ;;  %s2177_s8 = inlined_call_operand.hbm [shape: f32[16,32], index: 8, kind: input, shape index: {}]   ;;  %s2178_s9 = inlined_call_operand.hbm [shape: f32[16,32], index: 9, kind: input, shape index: {}]   ;;  %s2179_s10 = inlined_call_operand.hbm [shape: f32[2,16,32], index: 10, kind: output, shape index: {0}]   ;;  %s2180_s11 = inlined_call_operand.hbm [shape: f32[2,16,32], index: 11, kind: output, shape index: {1}]   ;;  %s2181_s12 = inlined_call_operand.hbm [shape: f32[2,16,32], index: 12, kind: output, shape index: {2}]  }
   0x1   :  { %2191 = sst [smem:[#allocation26_spill]] %s2169_s0 }
   0x2   :  { %2192 = sst [smem:[#allocation27_spill]] %s2170_s1 }
   0x3   :  { %2193 = sst [smem:[#allocation28_spill]] %s2171_s2 }
   0x4   :  { %2194 = sst [smem:[#allocation29_spill]] %s2172_s3 }
   0x5   :  { %2195 = sst [smem:[#allocation30_spill]] %s2173_s4 }
   0x6   :  { %2196 = sst [smem:[#allocation31_spill]] %s2177_s8 }
   0x7   :  { %2197 = sst [smem:[#allocation32_spill]] %s2178_s9 }
   0x8   :  { %2198 = sst [smem:[#allocation33_spill]] %s2179_s10 }
   0x9   :  { %2199 = sst [smem:[#allocation34_spill]] %s2181_s12 }
   0xa   :  { %18 = vsyncpa [#allocation3], 0 }
   0xb   :  { %20 = vsyncpa [#allocation3 + $0x1], 0 }
   0xc   :  { %21 = vsyncpa [#allocation6], 0 }
   0xd   :  { %22 = vsyncpa [#allocation9], 0 }
   0xe   :  { %23 = vsyncpa [#allocation12], 0 }
   0xf   :  { %24 = vsyncpa [#allocation4], 0 }
  0x10   :  { %26 = vsyncpa [#allocation4 + $0x1], 0 }
  0x11   :  { %27 = vsyncpa [#allocation15], 0 }
  0x12   :  { %29 = vsyncpa [#allocation15 + $0x1], 0  ;;  %s1773_s21 = smov 0   ;;  %s1775_s22 = smov 0  }
  0x13   :  { %s1777_s23 = smov 0   ;;  %s1779_s24 = smov 0  }
  0x14   :  { %s1781_s25 = smov 0   ;;  %s1783_s26 = smov 0  }
  0x15 LB: > { %2200 = sst [smem:[#allocation23_spill]] %s1688_s25  ;;  %s1804_s27 = sadd.s32 4294967295, %s1692_s26   ;;  %s1692_s26 = sphi %s1783_s26, %s35_s26   ;;  %s1688_s25 = sphi %s1781_s25, %s2228_s25   ;;  %s1684_s24 = sphi %s1779_s24, %s2227_s24   ;;  %s1680_s23 = sphi %s1777_s23, %s2231_s23   ;;  %s1676_s22 = sphi %s1775_s22, %s2230_s22   ;;  %s1672_s21 = sphi %s1773_s21, %s2229_s21  }
  0x16   : > { %p1167_p0 = scmp.ge.s32.totalorder %s1692_s26, 1  ;;  %p70_p1 = scmp.eq.s32.totalorder %s1804_s27, 0 }
  0x17   : > { %p363_p2 = scmp.lt.s32.totalorder %s1692_s26, 3  ;;  %s2201_s1 = sld [smem:[#allocation27_spill]] }
  0x18   : > { %s1694_s14 = smov [#allocation5]   ;;  %p1173_p6 = scmp.ge.s32.totalorder %s1692_s26, 2 }
  0x19   : > { %p1812_p3 = pnand %p1167_p0, %p363_p2  ;;  %s376_s15 = sshll.u32 %s1694_s14, 4  ;;  %s377_s15 = int_to_ptr.vmem [resolvable:$true] %s376_s15 }
  0x1a   : > { %s2204_s3 = sld [smem:[#allocation29_spill]]  ;;  %s2184_s20 = smov 128  }
  0x1b   : > { %p1240_p4 = pneg %p1812_p3  ;;  %s2185_s28 = smov 8  }
  0x1c   : > { %s1697_s29 = smov [#allocation8]   ;;  %s2205_s2 = sld [smem:[#allocation28_spill]] }
  0x1d   : > { %s374_s30 = sshll.u32 %s2201_s1, 4  ;;  %p1820_p5 = pnand %p1240_p4, %p70_p1  ;;  %s375_s30 = int_to_ptr.hbm [resolvable:$true] %s374_s30 }
  0x1e   : > { %s404_s14 = sshll.u32 %s1697_s29, 4  ;;  %s2206_s8 = sld [smem:[#allocation31_spill]]  ;;  %s405_s14 = int_to_ptr.vmem [resolvable:$true] %s404_s14 }
  0x1f   : > { %1243 = dma.hbm_to_vmem [thread:$0]  (!%p1820_p5), %s375_s30, 512, %s377_s15, [#allocation6], %s2184_s20, %s2184_s20, %s2185_s28  }
  0x20   : > { %s402_s19 = sshll.u32 %s2204_s3, 4  ;;  %s1698_s30 = smov [#allocation7]   ;;  %s403_s19 = int_to_ptr.hbm [resolvable:$true] %s402_s19 }
  0x21   : > { %1249 = dma.hbm_to_vmem [thread:$0]  (!%p1820_p5), %s403_s19, 512, %s405_s14, [#allocation9], %s2184_s20, %s2184_s20, %s2185_s28  }
  0x22   : > { %s388_s12 = sshll.u32 %s2205_s2, 4  ;;  %s390_s15 = sshll.u32 %s1698_s30, 4  ;;  %s389_s12 = int_to_ptr.hbm [resolvable:$true] %s388_s12  ;;  %s391_s15 = int_to_ptr.vmem [resolvable:$true] %s390_s15 }
  0x23   : > { %1246 = dma.hbm_to_vmem [thread:$0]  (!%p1820_p5), %s389_s12, 512, %s391_s15, [#allocation6], %s2184_s20, %s2184_s20, %s2185_s28  }
  0x24   : > { %s431_s3 = sshll.u32 %s2206_s8, 4  ;;  %s1699_s1 = smov [#allocation10]   ;;  %s432_s3 = int_to_ptr.hbm [resolvable:$true] %s431_s3 }
  0x25   : > { %s433_s10 = sshll.u32 %s1699_s1, 4  ;;  %s2207_s9 = sld [smem:[#allocation32_spill]]  ;;  %s434_s10 = int_to_ptr.vmem [resolvable:$true] %s433_s10 }
  0x26   : > { %1252 = dma.hbm_to_vmem [thread:$0]  (!%p1820_p5), %s432_s3, 256, %s434_s10, [#allocation9], %s2184_s20, %s2184_s20, %s2185_s28  }
  0x27   : > { %s1700_s12 = smov [#allocation11]   ;;  %s2186_s18 = sadd.s32 4294967294, %s1692_s26  }
  0x28   : > { %s450_s17 = sshll.u32 %s1700_s12, 4  ;;  %s47_s30 = sadd.s32 1, %s1688_s25  ;;  %s451_s17 = int_to_ptr.vmem [resolvable:$true] %s450_s17 }
  0x29   : > { %s56_s15 = sadd.s32 1, %s1680_s23  ;;  %p49_p7 = scmp.ge.s32.totalorder %s47_s30, 2 }
  0x2a   : > { %p63_p8 = scmp.ne.s32.totalorder %s1680_s23, %s1676_s22  ;;  %p64_p9 = scmp.eq.s32.totalorder %s1692_s26, 0 }
  0x2b   : > { %s448_s14 = sshll.u32 %s2207_s9, 4  ;;  %p69_p10 = scmp.ne.s32.totalorder %s1676_s22, %s1672_s21  ;;  %s449_s14 = int_to_ptr.hbm [resolvable:$true] %s448_s14 }
  0x2c   : > { %1255 = dma.hbm_to_vmem [thread:$0]  (!%p1820_p5), %s449_s14, 256, %s451_s17, [#allocation12], %s2184_s20, %s2184_s20, %s2185_s28  }
  0x2d   : > { %s2233_s30 = smov (%p49_p7, %s47_s30), 0  ;;  %p1872_p11 = por %p64_p9, %p63_p8 }
  0x2e   : > { %2208 = sst [smem:[#allocation24_spill]] %s2233_s30  ;;  %p1878_p12 = por %p70_p1, %p69_p10 }
  0x2f   : > { %s51_s1 = ssub.s32 %s1688_s25, %s2233_s30  ;;  %p294_p13 = scmp.eq.s32.totalorder %s1804_s27, 1 }
  0x30   : > { %p54_p0 = scmp.eq.s32.totalorder %s51_s1, 0  ;;  %p300_p2 = scmp.eq.s32.totalorder %s2186_s18, 1 }
  0x31   : > { %p1887_p4 = por %p294_p13, %p63_p8  ;;  %p1275_p5 = scmp.lt.s32.totalorder %s1692_s26, 2 }
  0x32   : > { %s1893_s19 = scalar_select %p54_p0, %s1680_s23, %s56_s15  }
  0x33   : > { %p1895_p7 = por %p300_p2, %p69_p10  ;;  %s464_s14 = sand.u32 1, %s1680_s23  }
  0x34   : > { %s1174_s12 = sshll.u32 %s464_s14, 4  ;;  %s1204_s17 = sshll.u32 %s1688_s25, 4 }
  0x35   : > { %s2213_s0 = sld [smem:[#allocation26_spill]]  ;;  %s468_s2 = scalar_lea.vmem [#allocation2], %s1174_s12 }
  0x36   : > { %s478_s18 = sshll.u32 %s468_s2, 4  ;;  %p1257_p8 = pnand %p1275_p5, %p1872_p11  ;;  %s479_s18 = int_to_ptr.vmem [resolvable:$true] %s478_s18 }
  0x37   : > { %s465_s15 = scalar_lea.sflag [#allocation3], %s464_s14  ;;  %s2214_s9 = smov 8  }
  0x38   : > { %s2215_s30 = smov 128  }
  0x39   : > { %490 = sbr.rel (%p1812_p3) target bundleno = 658 (0x292), region = 60 }
  0x3b   : > { %s475_s1 = scalar_lea.hbm %s2213_s0, %s1204_s17 }
  0x3c   : > { %s476_s8 = sshll.u32 %s475_s1, 4  ;;  %s477_s8 = int_to_ptr.hbm [resolvable:$true] %s476_s8 }
  0x3d   : > { %1259 = dma.hbm_to_vmem [thread:$0]  (!%p1257_p8), %s477_s8, 256, %s479_s18, %s465_s15, %s2215_s30, %s2215_s30, %s2214_s9  }
  0x3e   : > { %s1912_s25 = sand.u32 1, %s1676_s22  }
  0x3f   : > { %s1915_s2 = sshll.u32 %s1912_s25, 4  ;;  %s493_s20 = scalar_lea.sflag [#allocation3], %s1912_s25 }
  0x40   : > { %s496_s28 = scalar_lea.vmem [#allocation2], %s1915_s2 }
  0x41   : > { %1647 = dma.done.wait (%p1878_p12), %s493_s20, 256  }
  0x42   : > { %1649 = vsyncadd (%p1878_p12), %s493_s20, 4294967040 }
  0x43   : > { %1651 = dma.done.wait (%p70_p1), [#allocation6], 1024  }
  0x44   : > { %1653 = vsyncadd (%p70_p1), [#allocation6], 4294966272 }
  0x45   : > { %1655 = dma.done.wait (%p70_p1), [#allocation9], 768  }
  0x46   : > { %1657 = vsyncadd (%p70_p1), [#allocation9], 4294966528 }
  0x47   : > { %1659 = dma.done.wait (%p70_p1), [#allocation12], 256  }
  0x48   : > { %1661 = vsyncadd (%p70_p1), [#allocation12], 4294967040  ;;  %v584_v0 = vld [vmem:[#allocation5 + $0x18] sm:$0xff]  ;;  %v583_v2 = vld [vmem:[#allocation5 + $0x10] sm:$0xff]  ;;  %vm585_vm0 = vcmask 261120   ;;  %v1701_v18 = vmov 32.0  }
  0x49   : > { %v618_v1 = vld [vmem:[#allocation7 + $0x18] sm:$0xff]  ;;  %604 = vmatpush.msra.mxu0 %v584_v0  ;;  %v617_v3 = vld [vmem:[#allocation7 + $0x10] sm:$0xff]  ;;  %1208 = vmatpush.msra.mxu3 %v584_v0  ;;  %v582_v4 = vld [vmem:[#allocation5 + $0x8] sm:$0xff]  ;;  %1348 = vrcp.f32 %v1701_v18  ;;  %s2216_s4 = sld [smem:[#allocation30_spill]]  ;;  %s1702_s12 = smov 124   ;;  %vm808_vm14 = vcmask 228352  }
  0x4a   : > { %631 = vmatpush.msra.mxu1 %v618_v1  ;;  %v616_v5 = vld [vmem:[#allocation7 + $0x8] sm:$0xff]  ;;  %v581_v6 = vld [vmem:[#allocation5] sm:$0xff]  ;;  %v645_v49 = vld [vmem:[#allocation8 + $0x18] sm:$0xff]  ;;  %s1703_s17 = smov 100   ;;  %s1704_s1 = smov 4   ;;  %vm823_vm15 = vcmask 31744  }
  0x4b   : > { %605 = vmatpush.msra.mxu0 %v583_v2  ;;  %1209 = vmatpush.msra.mxu3 %v583_v2  ;;  %v615_v7 = vld [vmem:[#allocation7] sm:$0xff]  ;;  %v1937_v9 = vld [vmem:[%s496_s28 + $0x8] sm:$0xff]  ;;  %v644_v50 = vld [vmem:[#allocation8 + $0x10] sm:$0xff]  ;;  %s1705_s15 = smov 28   ;;  %s2016_s20 = scalar_lea.vmem [#allocation16], %s1915_s2 }
  0x4c   : > { %632 = vmatpush.msra.mxu1 %v617_v3  ;;  %v1935_v8 = vld [vmem:[%s496_s28] sm:$0xff]  ;;  %658 = vmatpush.msra.mxu2 %v645_v49  ;;  %v643_v53 = vld [vmem:[#allocation8 + $0x8] sm:$0xff]  ;;  %s2034_s28 = scalar_lea.vmem [#allocation14], %s1915_s2  ;;  %s2044_s8 = sshll.u32 %s1684_s24, 4 }
  0x4d   : > { %606 = vmatpush.msra.mxu0 %v582_v4  ;;  %1210 = vmatpush.msra.mxu3 %v582_v4  ;;  %v642_v54 = vld [vmem:[#allocation8] sm:$0xff]  ;;  %s2047_s9 = scalar_lea.vmem [#allocation13], %s1915_s2  ;;  %s934_s30 = scalar_lea.hbm %s2180_s11, %s2044_s8 }
  0x4e   : > { %633 = vmatpush.msra.mxu1 %v616_v5  ;;  %659 = vmatpush.msra.mxu2 %v644_v50  ;;  %s896_s24 = sand.u32 1, %s1804_s27   ;;  %s2219_s14 = sld [smem:[#allocation34_spill]] }
  0x4f   : > { %607 = vmatpush.msra.mxu0 %v581_v6  ;;  %1211 = vmatpush.msra.mxu3 %v581_v6  ;;  %v1349_v19 = vpop.eup %1348  ;;  %s2221_s13 = sld [smem:[#allocation33_spill]] }
  0x50   : > { %634 = vmatpush.msra.mxu1 %v615_v7  ;;  %1187 = vmatmul.msk.f32.vlgmr.msra.gmra.mxu0 %vm585_vm0, %v1935_v8  ;;  %v678_v20 = vmul.f32 32.0, %v1349_v19  ;;  %vm682_vm1 = vweird.f32 %v1349_v19 }
  0x51   : > { %1189 = vmatmul.msk.f32.vlgmr.msra.gmra.mxu1 %vm585_vm0, %v1935_v8  ;;  %1188 = vmatmul.msk.f32.vlgmr.msra.gmra.mxu3 %vm585_vm0, %v1937_v9 }
  0x52   : > { %v679_v21 = vsub.f32 1.0, %v678_v20  ;;  %660 = vmatpush.msra.mxu2 %v643_v53  ;;  %v1346_v20 = vld [vmem:[%s2176_s7] ss:$0 sm:$0xff] }
  0x53   : > { %v788_v53 = vld [vmem:[#allocation10] sm:$0xff] }
  0x54   : > { %v680_v22 = vmul.f32 %v1349_v19, %v679_v21  ;;  %661 = vmatpush.msra.mxu2 %v642_v54  ;;  %v790_v54 = vld [vmem:[#allocation11] sm:$0xff]  ;;  %s953_s2 = scalar_lea.hbm %s2219_s14, %s2044_s8 }
  0x55   : > { %1191 = vmatmul.msk.f32.vlgmr.msra.gmra.mxu2 %vm585_vm0, %v1935_v8  ;;  %s2069_s27 = sshll.u32 %s953_s2, 4 }
  0x56   : > { %v681_v23 = vadd.f32 %v1349_v19, %v680_v22  ;;  %2220 = sst [smem:[#allocation25_spill]] %s2069_s27  ;;  %s1558_s27 = scalar_lea.hbm %s2180_s11, 32 }
  0x58   : > { %v683_v24 = vsel %vm682_vm1, %v1349_v19, %v681_v23  ;;  %v1347_v23 = vld [vmem:[%s2174_s5] ss:$0 sm:$0xff] }
  0x59   : > { %1190 = vmatmul.msk.f32.gmra.mxu1 %vm585_vm0, %v1937_v9 }
  0x5d   : > { %1192 = vmatmul.msk.f32.gmra.mxu2 %vm585_vm0, %v1937_v9  ;;  %v1345_v9 = vld [vmem:[%s2216_s4] ss:$0 sm:$0xff] }
  0xcd   : > { %v609_v10 = vpop.f32.mrf.mxu0 }
  0xce   : > { %v636_v11 = vpop.f32.mrf.mxu1  ;;  %v671_v13 = vsel %vm585_vm0, %v609_v10, 0.0 }
  0xcf   : > { %v734_v12 = vsel %vm585_vm0, %v636_v11, 0.0  ;;  %672 = vadd.xlane.f32.xlu1 %v671_v13 }
  0xd0   : > { %735 = vadd.xlane.f32.xlu0 %v734_v12  ;;  %v1344_v12 = vld [vmem:[%s2175_s6] ss:$0 sm:$0xff] }
  0xd4   : > { %v612_v14 = vpop.f32.mrf.mxu3 }
  0xd5   : > { %v674_v17 = vsel %vm585_vm0, %v612_v14, 0.0 }
  0xd6   : > { %v639_v15 = vpop.f32.mrf.mxu1 }
  0xd7   : > { %v737_v16 = vsel %vm585_vm0, %v639_v15, 0.0  ;;  %675 = vadd.xlane.f32.xlu1 %v674_v17 }
  0xd8   : > { %738 = vadd.xlane.f32.xlu0 %v737_v16 }
 0x142   : > { %v673_v26 = vpop.xlane.xlu1 %672 }
 0x143   : > { %v736_v25 = vpop.xlane.xlu0 %735  ;;  %v684_v28 = vmul.f32 %v683_v24, %v673_v26 }
 0x144   : > { %v740_v27 = vmul.f32 %v736_v25, %v683_v24 }
 0x145   : > { %v1953_v30 = vsub.f32 %v609_v10, %v684_v28 }
 0x146   : > { %v1951_v29 = vsub.f32 %v636_v11, %v740_v27 }
 0x147   : > { %v688_v32 = vmul.f32 %v1953_v30, %v1953_v30 }
 0x148   : > { %v744_v31 = vmul.f32 %v1951_v29, %v1951_v29 }
 0x149   : > { %v690_v34 = vsel %vm585_vm0, %v688_v32, 0.0 }
 0x14a   : > { %v746_v33 = vsel %vm585_vm0, %v744_v31, 0.0  ;;  %691 = vadd.xlane.f32.xlu0 %v690_v34  ;;  %v676_v36 = vpop.xlane.xlu1 %675 }
 0x14b   : > { %747 = vadd.xlane.f32.xlu2 %v746_v33  ;;  %v739_v35 = vpop.xlane.xlu0 %738  ;;  %v685_v38 = vmul.f32 %v683_v24, %v676_v36 }
 0x14c   : > { %v741_v37 = vmul.f32 %v739_v35, %v683_v24 }
 0x14d   : > { %v1963_v40 = vsub.f32 %v612_v14, %v685_v38 }
 0x14e   : > { %v1961_v39 = vsub.f32 %v639_v15, %v741_v37 }
 0x14f   : > { %v689_v42 = vmul.f32 %v1963_v40, %v1963_v40 }
 0x150   : > { %v745_v41 = vmul.f32 %v1961_v39, %v1961_v39 }
 0x151   : > { %v693_v44 = vsel %vm585_vm0, %v689_v42, 0.0 }
 0x152   : > { %v749_v43 = vsel %vm585_vm0, %v745_v41, 0.0  ;;  %694 = vadd.xlane.f32.xlu1 %v693_v44  ;;  %v826_v44 = vlaneseq }
 0x153   : > { %750 = vadd.xlane.f32.xlu2 %v749_v43 }
 0x1bd   : > { %v692_v46 = vpop.xlane.xlu0 %691 }
 0x1be   : > { %v748_v45 = vpop.xlane.xlu2 %747  ;;  %v696_v48 = vmul.f32 %v692_v46, %v683_v24  ;;  %v663_v46 = vpop.f32.mrf.mxu2 }
 0x1bf   : > { %v752_v47 = vmul.f32 %v748_v45, %v683_v24  ;;  %v827_v45 = vand.u32 127, %v826_v44  ;;  %889 = vst.msk [vmem:[%s2016_s20] sm:$0xff] %vm585_vm0, %v663_v46 }
 0x1c0   : > { %v698_v52 = vadd.f32 1e-05, %v696_v48 }
 0x1c1   : > { %v754_v51 = vadd.f32 1e-05, %v752_v47  ;;  %v832_v50 = vand.u32 7, %v827_v45 }
 0x1c2   : > { %vm706_vm6 = vweird.f32 %v698_v52 }
 0x1c3   : > { %1350 = vrsqrt.f32 %v754_v51  ;;  %vm762_vm4 = vweird.f32 %v754_v51  ;;  %vm2022_vm1 = vcmp.lt.s32.totalorder %v832_v50, 4 }
 0x1c4   : > { %1352 = vrsqrt.f32 %v698_v52 }
 0x1c5   : > { %v695_v56 = vpop.xlane.xlu1 %694 }
 0x1c6   : > { %v751_v55 = vpop.xlane.xlu2 %750  ;;  %v697_v58 = vmul.f32 %v695_v56, %v683_v24 }
 0x1c7   : > { %v753_v57 = vmul.f32 %v751_v55, %v683_v24 }
 0x1c8   : > { %v699_v61 = vadd.f32 1e-05, %v697_v58 }
 0x1c9   : > { %v1351_v59 = vpop.eup %1350  ;;  %v755_v60 = vadd.f32 1e-05, %v753_v57 }
 0x1ca   : > { %v1353_v62 = vpop.eup %1352  ;;  %v757_v63 = vmul.f32 %v1351_v59, %v754_v51  ;;  %vm763_vm2 = vweird.f32 %v1351_v59  ;;  %vm716_vm10 = vweird.f32 %v699_v61 }
 0x1cb   : > { %v701_v0 = vmul.f32 %v1353_v62, %v698_v52  ;;  %1354 = vrsqrt.f32 %v755_v60  ;;  %vm707_vm3 = vweird.f32 %v1353_v62  ;;  %vm764_vm5 = vmor %vm762_vm4, %vm763_vm2  ;;  %vm772_vm12 = vweird.f32 %v755_v60  ;;  %v666_v52 = vpop.f32.mrf.mxu2 }
 0x1cc   : > { %v758_v1 = vmul.f32 %v1351_v59, %v757_v63  ;;  %1356 = vrsqrt.f32 %v699_v61  ;;  %vm708_vm7 = vmor %vm706_vm6, %vm707_vm3  ;;  %890 = vst.msk [vmem:[%s2016_s20 + $0x8] sm:$0xff] %vm585_vm0, %v666_v52 }
 0x1cd   : > { %v702_v2 = vmul.f32 %v1353_v62, %v701_v0 }
 0x1ce   : > { %v759_v3 = vmul.f32 0.5, %v758_v1 }
 0x1cf   : > { %v703_v4 = vmul.f32 0.5, %v702_v2 }
 0x1d0   : > { %v760_v5 = vsub.f32 1.5, %v759_v3 }
 0x1d1   : > { %v1355_v6 = vpop.eup %1354  ;;  %v704_v7 = vsub.f32 1.5, %v703_v4 }
 0x1d2   : > { %v1357_v8 = vpop.eup %1356  ;;  %v761_v10 = vmul.f32 %v1351_v59, %v760_v5  ;;  %v767_v11 = vmul.f32 %v1355_v6, %v755_v60  ;;  %vm773_vm9 = vweird.f32 %v1355_v6 }
 0x1d3   : > { %v705_v13 = vmul.f32 %v1353_v62, %v704_v7  ;;  %v711_v14 = vmul.f32 %v1357_v8, %v699_v61  ;;  %vm717_vm8 = vweird.f32 %v1357_v8  ;;  %vm774_vm13 = vmor %vm772_vm12, %vm773_vm9 }
 0x1d4   : > { %v765_v15 = vsel %vm764_vm5, %v1351_v59, %v761_v10  ;;  %v768_v16 = vmul.f32 %v1355_v6, %v767_v11  ;;  %vm718_vm11 = vmor %vm716_vm10, %vm717_vm8 }
 0x1d5   : > { %v776_v17 = vmul.f32 %v765_v15, %v1951_v29  ;;  %v709_v18 = vsel %vm708_vm7, %v1353_v62, %v705_v13  ;;  %v712_v19 = vmul.f32 %v1357_v8, %v711_v14  ;;  %v791_v13 = vld [vmem:[#allocation11 + $0x8] sm:$0xff] }
 0x1d6   : > { %v720_v21 = vmul.f32 %v709_v18, %v1953_v30  ;;  %v769_v22 = vmul.f32 0.5, %v768_v16 }
 0x1d7   : > { %v781_v24 = vmul.f32 %v1344_v12, %v776_v17  ;;  %v713_v25 = vmul.f32 0.5, %v712_v19 }
 0x1d8   : > { %v725_v26 = vmul.f32 %v1345_v9, %v720_v21  ;;  %v770_v27 = vsub.f32 1.5, %v769_v22 }
 0x1d9   : > { %v714_v28 = vsub.f32 1.5, %v713_v25  ;;  %v1989_v29 = vadd.f32 %v1346_v20, %v781_v24 }
 0x1da   : > { %v1991_v31 = vadd.f32 %v1347_v23, %v725_v26  ;;  %v771_v32 = vmul.f32 %v1355_v6, %v770_v27 }
 0x1db   : > { %v715_v33 = vmul.f32 %v1357_v8, %v714_v28  ;;  %853 = vrot.lane.b32.xlu0 %v1989_v29, %s1702_s12  ;;  %v849_v61 = vmul.f32 %v788_v53, %v1989_v29 }
 0x1dc   : > { %796 = vrot.lane.b32.xlu2 %v1991_v31, %s1702_s12  ;;  %811 = vrot.lane.b32.xlu1 %v1991_v31, %s1703_s17  ;;  %v775_v35 = vsel %vm774_vm13, %v1355_v6, %v771_v32  ;;  %v792_v6 = vmul.f32 %v788_v53, %v1991_v31 }
 0x1dd   : > { %v719_v30 = vsel %vm718_vm11, %v1357_v8, %v715_v33  ;;  %v777_v37 = vmul.f32 %v775_v35, %v1961_v39 }
 0x1de   : > { %v721_v34 = vmul.f32 %v719_v30, %v1963_v40 }
 0x1df   : > { %v782_v41 = vmul.f32 %v1344_v12, %v777_v37  ;;  %v789_v12 = vld [vmem:[#allocation10 + $0x8] sm:$0xff] }
 0x1e0   : > { %v726_v36 = vmul.f32 %v1345_v9, %v721_v34 }
 0x1e1   : > { %v2003_v42 = vadd.f32 %v1346_v20, %v782_v41 }
 0x1e2   : > { %v1998_v38 = vadd.f32 %v1347_v23, %v726_v36 }
 0x1e3   : > { %873 = vrot.lane.b32.xlu0 %v1989_v29, %s1704_s1  ;;  %v850_v16 = vmul.f32 %v789_v12, %v2003_v42 }
 0x1e4   : > { %859 = vrot.lane.b32.xlu2 %v1989_v29, %s1705_s15  ;;  %798 = vrot.lane.b32.xlu1 %v1998_v38, %s1702_s12 }
 0x1eb   : > { %802 = vrot.lane.b32.xlu0 %v1991_v31, %s1705_s15 }
 0x1ec   : > { %867 = vrot.lane.b32.xlu2 %v1989_v29, %s1703_s17  ;;  %855 = vrot.lane.b32.xlu1 %v2003_v42, %s1702_s12  ;;  %s954_s12 = sshll.u32 %s2016_s20, 4  ;;  %s2072_s12 = int_to_ptr.vmem [resolvable:$true] %s954_s12 }
 0x1f3   : > { %861 = vrot.lane.b32.xlu0 %v2003_v42, %s1705_s15 }
 0x1f4   : > { %804 = vrot.lane.b32.xlu2 %v1998_v38, %s1705_s15  ;;  %869 = vrot.lane.b32.xlu1 %v2003_v42, %s1703_s17 }
 0x1fb   : > { %813 = vrot.lane.b32.xlu0 %v1998_v38, %s1703_s17  ;;  %s935_s17 = sshll.u32 %s2034_s28, 4  ;;  %s936_s17 = int_to_ptr.vmem [resolvable:$true] %s935_s17 }
 0x1fc   : > { %875 = vrot.lane.b32.xlu2 %v2003_v42, %s1704_s1  ;;  %819 = vrot.lane.b32.xlu1 %v1998_v38, %s1704_s1 }
 0x204   : > { %817 = vrot.lane.b32.xlu2 %v1991_v31, %s1704_s1  ;;  %s2066_s1 = sshll.u32 %s934_s30, 4  ;;  %s2081_s30 = scalar_lea.sflag [#allocation15], %s896_s24  ;;  %s938_s1 = int_to_ptr.hbm [resolvable:$true] %s2066_s1 }
 0x205   : > { %s1552_s3 = sshra.s32 %s938_s1, 4  ;;  %s1553_s3 = int_to_ptr.hbm [resolvable:$true] %s1552_s3 }
 0x206   : > { %s1554_s16 = scalar_lea.hbm %s1553_s3, 16  ;;  %p1559_p10 = scmp.lt.s32.totalorder %s1553_s3, %s2180_s11 }
 0x207   : > { %p1555_p1 = scmp.ne.s32.totalorder %s1553_s3, %s1554_s16  ;;  %p1560_p11 = scmp.lt.s32.totalorder %s1558_s27, %s1554_s16 }
 0x209   : > { %p1556_p3 = pnand %p1555_p1, %p1887_p4  ;;  %p1561_p12 = por %p1560_p11, %p1559_p10 }
 0x20b   : > { %p1557_p9 = pneg %p1556_p3 }
 0x20d   : > { %p1562_p13 = pnand %p1561_p12, %p1557_p9 }
 0x236   : > { %v797_v39 = vpop.permute.xlu2 %796 }
 0x23e   : > { %v860_v40 = vpop.permute.xlu2 %859 }
 0x246   : > { %v868_v43 = vpop.permute.xlu2 %867 }
 0x24d   : > { %v854_v47 = vpop.permute.xlu0 %853 }
 0x24e   : > { %v2020_v48 = vpop.permute.xlu2 %804  ;;  %v812_v49 = vpop.permute.xlu1 %811  ;;  %v865_v56 = vsel %vm808_vm14, %v854_v47, %v860_v40 }
 0x255   : > { %v874_v55 = vpop.permute.xlu0 %873 }
 0x256   : > { %v879_v57 = vsel %vm823_vm15, %v868_v43, %v874_v55  ;;  %v876_v58 = vpop.permute.xlu2 %875  ;;  %v799_v59 = vpop.permute.xlu1 %798 }
 0x257   : > { %v881_v60 = vsel %vm2022_vm1, %v865_v56, %v879_v57 }
 0x258   : > { %v883_v62 = vmul.f32 %v881_v60, %v790_v54 }
 0x25a   : > { %v885_v63 = vadd.f32 %v883_v62, %v849_v61 }
 0x25c   : > { %887 = vst.msk [vmem:[%s2034_s28] sm:$0xff] %vm585_vm0, %v885_v63 }
 0x25d   : > { %v803_v0 = vpop.permute.xlu0 %802 }
 0x25e   : > { %v809_v1 = vsel %vm808_vm14, %v797_v39, %v803_v0  ;;  %v818_v2 = vpop.permute.xlu2 %817  ;;  %v856_v3 = vpop.permute.xlu1 %855 }
 0x25f   : > { %v824_v4 = vsel %vm823_vm15, %v812_v49, %v818_v2 }
 0x260   : > { %v841_v5 = vsel %vm2022_vm1, %v809_v1, %v824_v4 }
 0x261   : > { %v843_v7 = vmul.f32 %v841_v5, %v790_v54 }
 0x263   : > { %v845_v8 = vadd.f32 %v843_v7, %v792_v6 }
 0x265   : > { %847 = vst.msk [vmem:[%s2047_s9] sm:$0xff] %vm585_vm0, %v845_v8  ;;  %v862_v10 = vpop.permute.xlu0 %861 }
 0x266   : > { %v866_v11 = vsel %vm808_vm14, %v856_v3, %v862_v10  ;;  %v870_v14 = vpop.permute.xlu1 %869 }
 0x267   : > { %v880_v15 = vsel %vm823_vm15, %v870_v14, %v876_v58 }
 0x268   : > { %v882_v9 = vsel %vm2022_vm1, %v866_v11, %v880_v15 }
 0x269   : > { %v884_v17 = vmul.f32 %v882_v9, %v791_v13 }
 0x26b   : > { %v886_v18 = vadd.f32 %v884_v17, %v850_v16 }
 0x26d   : > { %888 = vst.msk [vmem:[%s2034_s28 + $0x8] sm:$0xff] %vm585_vm0, %v886_v18  ;;  %v814_v19 = vpop.permute.xlu0 %813 }
 0x26e   : > { %v820_v20 = vpop.permute.xlu1 %819 }
 0x26f   : > { %1565 = shalt.err (!%p1562_p13)
}
 0x270   : > { %s1706_s24 = smov 128   ;;  %s2222_s15 = sld [smem:[#allocation25_spill]]  ;;  %v810_v21 = vsel %vm808_vm14, %v799_v59, %v2020_v48  ;;  %v825_v22 = vsel %vm823_vm15, %v814_v19, %v820_v20 }
 0x271   : > { %s1707_s20 = smov 8   ;;  %s1586_s2 = scalar_lea.hbm %s2219_s14, 32 }
 0x272   : > { %1235 = dma.vmem_to_hbm [thread:$0]  (%p1887_p4), %s936_s17, 256, %s938_s1, %s2081_s30, %s1706_s24, %s1706_s24, %s1707_s20  }
 0x276   : > { %s2223_s0 = int_to_ptr.hbm [resolvable:$true] %s2222_s15 }
 0x277   : > { %s1580_s4 = sshra.s32 %s2223_s0, 4  ;;  %s1581_s4 = int_to_ptr.hbm [resolvable:$true] %s1580_s4 }
 0x278   : > { %s1582_s27 = scalar_lea.hbm %s1581_s4, 16  ;;  %p1587_p8 = scmp.lt.s32.totalorder %s1581_s4, %s2219_s14 }
 0x279   : > { %p1583_p0 = scmp.ne.s32.totalorder %s1581_s4, %s1582_s27  ;;  %p1588_p1 = scmp.lt.s32.totalorder %s1586_s2, %s1582_s27 }
 0x27b   : > { %p1584_p2 = pnand %p1583_p0, %p1887_p4  ;;  %p1589_p3 = por %p1588_p1, %p1587_p8 }
 0x27d   : > { %p1585_p5 = pneg %p1584_p2 }
 0x27f   : > { %p1590_p9 = pnand %p1589_p3, %p1585_p5 }
 0x281   : > { %1593 = shalt.err (!%p1590_p9)
}
 0x282   : > { %s2224_s17 = smov %s2223_s0  ;;  %v842_v23 = vsel %vm2022_vm1, %v810_v21, %v825_v22  ;;  %s916_s1 = sshll.u32 %s2047_s9, 4  ;;  %v793_v24 = vmul.f32 %v789_v12, %v1998_v38  ;;  %s917_s1 = int_to_ptr.vmem [resolvable:$true] %s916_s1 }
 0x283   : > { %1236 = dma.vmem_to_hbm [thread:$0]  (%p1887_p4), %s2072_s12, 256, %s2224_s17, %s2081_s30, %s1706_s24, %s1706_s24, %s1707_s20   ;;  %v844_v25 = vmul.f32 %v842_v23, %v791_v13 }
 0x284   : > { %s2225_s4 = scalar_lea.hbm %s2221_s13, %s2044_s8  ;;  %s892_s15 = scalar_lea.sflag [#allocation4], %s1912_s25 }
 0x285   : > { %s918_s27 = sshll.u32 %s2225_s4, 4  ;;  %v846_v26 = vadd.f32 %v844_v25, %v793_v24  ;;  %s1614_s8 = scalar_lea.hbm %s2221_s13, 32  ;;  %s919_s27 = int_to_ptr.hbm [resolvable:$true] %s918_s27 }
 0x286   : > { %s1608_s3 = sshra.s32 %s919_s27, 4  ;;  %s1609_s3 = int_to_ptr.hbm [resolvable:$true] %s1608_s3 }
 0x287   : > { %848 = vst.msk [vmem:[%s2047_s9 + $0x8] sm:$0xff] %vm585_vm0, %v846_v26  ;;  %s1610_s12 = scalar_lea.hbm %s1609_s3, 16  ;;  %p1615_p13 = scmp.lt.s32.totalorder %s1609_s3, %s2221_s13 }
 0x288   : > { %p1611_p10 = scmp.ne.s32.totalorder %s1609_s3, %s1610_s12  ;;  %p1616_p0 = scmp.lt.s32.totalorder %s1614_s8, %s1610_s12 }
 0x28a   : > { %p1612_p11 = pnand %p1611_p10, %p1887_p4  ;;  %p1617_p2 = por %p1616_p0, %p1615_p13 }
 0x28c   : > { %p1613_p12 = pneg %p1612_p11 }
 0x28e   : > { %p1618_p5 = pnand %p1617_p2, %p1613_p12 }
 0x290   : > { %1621 = shalt.err (!%p1618_p5)
}
 0x291   : > { %1234 = dma.vmem_to_hbm [thread:$0]  (%p1887_p4), %s917_s1, 256, %s919_s27, %s892_s15, %s1706_s24, %s1706_s24, %s1707_s20  }
 0x292 PF: > { %s971_s25 = sand.u32 1, %s1672_s21   ;;  %p1261_p8 = pnand %p1173_p6, %p1895_p7 }
 0x293   : > { %s972_s9 = scalar_lea.sflag [#allocation4], %s971_s25 }
 0x294   : > { %p1262_p1 = pneg %p1261_p8 }
 0x296   : > { %1663 = dma.done.wait (%p1262_p1), %s972_s9, 256  }
 0x297   : > { %1665 = vsyncadd (%p1262_p1), %s972_s9, 4294967040  ;;  %s2226_s17 = sadd.s32 4294967294, %s1692_s26  }
 0x298   : > { %s981_s18 = sand.u32 1, %s2226_s17  }
 0x299   : > { %s982_s10 = scalar_lea.sflag [#allocation15], %s981_s18 }
 0x29a   : > { %1667 = dma.done.wait (%p1262_p1), %s982_s10, 512  }
 0x29b   : > { %1669 = vsyncadd (%p1262_p1), %s982_s10, 4294966784  ;;  %s35_s26 = sadd.s32 1, %s1692_s26   ;;  %s2227_s24 = sld [smem:[#allocation23_spill]] }
 0x29c   : > { %p32_p4 = scmp.ge.s32.totalorder %s35_s26, 4   ;;  %s2228_s25 = sld [smem:[#allocation24_spill]] }
 0x29d   : > { %s2229_s21 = smov %s1676_s22  ;;  %s2230_s22 = smov %s1680_s23 }
 0x29e   : > { %s2231_s23 = smov %s1893_s19  ;;  %34 = sbr.rel (!%p32_p4) target bundleno = 21 (0x15), region = 159 }
 0x2a3   :  { %998 = vsyncpa [#allocation3], 1 }
 0x2a4   :  { %1000 = vsyncpa [#allocation3 + $0x1], 1 }
 0x2a5   :  { %1001 = vsyncpa [#allocation6], 1 }
 0x2a6   :  { %1002 = vsyncpa [#allocation9], 1 }
 0x2a7   :  { %1003 = vsyncpa [#allocation12], 1 }
 0x2a8   :  { %1004 = vsyncpa [#allocation4], 1 }
 0x2a9   :  { %1006 = vsyncpa [#allocation4 + $0x1], 1 }
 0x2aa   :  { %1007 = vsyncpa [#allocation15], 1 }
 0x2ab   :  { %1009 = vsyncpa [#allocation15 + $0x1], 1 }

</bundles_post_ra>
